<compile_context>
chip_gen: v7x
topology: tpu7x:2x2x1
jax: 0.10.0
libtpu: 0.0.40
codegen_flags: <defaults>
</compile_context>

<pallas_src>
import functools

import jax
import jax.numpy as jnp
from jax.experimental import pallas as pl
from jax.experimental.pallas import tpu as pltpu


LANE = 128             # TPU lane width (last dim of every block)
MAX_BLOCK_ROWS = 1024  # 1024 x 128 f32 = 512 KiB per operand per block


def _round_up(x, m):
    return ((x + m - 1) // m) * m


def _pick_block_rows(*num_elements):
    """Choose a sublane-block size: big enough to hit the HBM roofline, small
    enough to avoid over-padding tiny inputs. Always a multiple of 8."""
    rows = max(-(-int(n) // LANE) for n in num_elements)
    return min(MAX_BLOCK_ROWS, _round_up(max(rows, 1), 8))


def _flatten_pad_2d(x, pad_value, block_rows):
    """Flatten to 1D, pad with a hinge-neutral value and reshape to
    (rows, LANE) with rows a multiple of block_rows."""
    flat = x.reshape(-1)
    n = flat.shape[0]
    rows = -(-n // LANE)
    padded_rows = _round_up(max(rows, 1), block_rows)
    pad = padded_rows * LANE - n
    if pad:
        flat = jnp.concatenate(
            [flat, jnp.full((pad,), pad_value, dtype=flat.dtype)])
    return flat.reshape(padded_rows, LANE)


# ----------------------------------------------------------------------------
# Kernels
# ----------------------------------------------------------------------------
def _hinge_pair_sum_kernel(dx_ref, dgz_ref, o_ref, acc_ref):
    """One grid step: partial sum of relu(1 - Dx) + relu(1 + DGz) over a
    (block_rows, 128) tile of each operand; scalar accumulator in SMEM."""
    @pl.when(pl.program_id(0) == 0)
    def _():
        acc_ref[0, 0] = jnp.float32(0.0)

    dx = dx_ref[...].astype(jnp.float32)
    dgz = dgz_ref[...].astype(jnp.float32)
    part = (jnp.sum(jnp.maximum(1.0 - dx, 0.0)) +
            jnp.sum(jnp.maximum(1.0 + dgz, 0.0)))
    acc_ref[0, 0] += part

    @pl.when(pl.program_id(0) == pl.num_programs(0) - 1)
    def _():
        o_ref[0, 0] = acc_ref[0, 0]


def _hinge_sum_kernel(x_ref, o_ref, acc_ref, *, sign):
    """Fallback single-tensor kernel: partial sum of relu(1 + sign * x)."""
    @pl.when(pl.program_id(0) == 0)
    def _():
        acc_ref[0, 0] = jnp.float32(0.0)

    x = x_ref[...].astype(jnp.float32)
    acc_ref[0, 0] += jnp.sum(jnp.maximum(1.0 + sign * x, 0.0))

    @pl.when(pl.program_id(0) == pl.num_programs(0) - 1)
    def _():
        o_ref[0, 0] = acc_ref[0, 0]


# ----------------------------------------------------------------------------
# Wrappers
# ----------------------------------------------------------------------------
def _hinge_pair_sum(dx, dgz, block_rows):
    """sum(relu(1 - Dx)) + sum(relu(1 + DGz)), Dx/DGz of identical shape."""
    dx2 = _flatten_pad_2d(dx, 1.0, block_rows)    # relu(1 - 1)  == 0 (neutral)
    dgz2 = _flatten_pad_2d(dgz, -1.0, block_rows)  # relu(1 + -1) == 0 (neutral)
    grid = dx2.shape[0] // block_rows
    s = pl.pallas_call(
        _hinge_pair_sum_kernel,
        out_shape=jax.ShapeDtypeStruct((1, 1), jnp.float32),
        grid=(grid,),
        in_specs=[
            pl.BlockSpec((block_rows, LANE), lambda i: (i, 0)),
            pl.BlockSpec((block_rows, LANE), lambda i: (i, 0)),
        ],
        out_specs=pl.BlockSpec(memory_space=pltpu.MemorySpace.SMEM),
        scratch_shapes=[pltpu.SMEM((1, 1), jnp.float32)],
        compiler_params=pltpu.CompilerParams(
            dimension_semantics=("arbitrary",)),
    )(dx2, dgz2)
    return s[0, 0]


def _hinge_sum(x, sign, block_rows):
    """sum(relu(1 + sign * x)) for a single tensor (shape-mismatch fallback)."""
    x2 = _flatten_pad_2d(x, -float(sign), block_rows)  # neutral padding
    grid = x2.shape[0] // block_rows
    kernel = functools.partial(_hinge_sum_kernel, sign=float(sign))
    s = pl.pallas_call(
        kernel,
        out_shape=jax.ShapeDtypeStruct((1, 1), jnp.float32),
        grid=(grid,),
        in_specs=[pl.BlockSpec((block_rows, LANE), lambda i: (i, 0))],
        out_specs=pl.BlockSpec(memory_space=pltpu.MemorySpace.SMEM),
        scratch_shapes=[pltpu.SMEM((1, 1), jnp.float32)],
        compiler_params=pltpu.CompilerParams(
            dimension_semantics=("arbitrary",)),
    )(x2)
    return s[0, 0]


def sn_patch_dis_loss(Dx, DGz, weight=1.0):
    """weight * ( mean(relu(1 - Dx)) + mean(relu(1 + DGz)) )."""
    if Dx.shape == DGz.shape:
        # Common case: stream both operands through one fused, pipelined pass.
        block_rows = _pick_block_rows(Dx.size, DGz.size)
        total = _hinge_pair_sum(Dx, DGz, block_rows)
        loss = total / jnp.float32(Dx.size)
    else:
        # torch.mean is taken per-tensor, so differing shapes are legal.
        real = _hinge_sum(Dx, -1.0, _pick_block_rows(Dx.size)) / jnp.float32(Dx.size)
        fake = _hinge_sum(DGz, +1.0, _pick_block_rows(DGz.size)) / jnp.float32(DGz.size)
        loss = real + fake
    return jnp.float32(weight) * loss


# ----------------------------------------------------------------------------
if __name__ == "__main__":
    key = jax.random.PRNGKey(0)
    k1, k2 = jax.random.split(key)

    # SN-Patch discriminator outputs for real / fake images: (N, 1, H, W) maps.
    Dx = jax.random.normal(k1, (2, 1, 16, 16), dtype=jnp.float32)
    DGz = jax.random.normal(k2, (2, 1, 16, 16), dtype=jnp.float32)

    loss_fn = jax.jit(functools.partial(sn_patch_dis_loss, weight=1.0))
    loss = jax.block_until_ready(loss_fn(Dx, DGz))

    # Pure-JAX reference of the PyTorch forward.
    ref = 1.0 * (jnp.mean(jax.nn.relu(1.0 - Dx)) + jnp.mean(jax.nn.relu(1.0 + DGz)))

    assert loss.shape == () and bool(jnp.isfinite(loss))
    assert jnp.allclose(loss, ref, rtol=1e-6, atol=1e-6), (loss, ref)
    print("KERNEL_OK")
</pallas_src>

<mosaic_0001>
module attributes {stable_mosaic.version = 11 : i64} {
  func.func @_hinge_pair_sum_kernel(%arg0: i32, %arg1: memref<8x128xf32, #tpu.memory_space<vmem>>, %arg2: memref<8x128xf32, #tpu.memory_space<vmem>>, %arg3: memref<1x1xf32, #tpu.memory_space<smem>>, %arg4: memref<1x1xf32, #tpu.memory_space<smem>>) attributes {dimension_semantics = [#tpu.dimension_semantics<arbitrary>], iteration_bounds = array<i64: 1>, scalar_prefetch = 0 : i64, scratch_operands = 1 : i64, tpu.core_type = #tpu.core_type<tc>, window_params = [{transform_indices = @transform_0, window_bounds = array<i64: 8, 128>}, {transform_indices = @transform_1, window_bounds = array<i64: 8, 128>}, {transform_indices = @transform_2, window_bounds = array<i64: 1, 1>}]} {
    %c0_i32 = arith.constant 0 : i32
    %0 = arith.cmpi eq, %arg0, %c0_i32 : i32
    %1 = arith.extui %0 : i1 to i32
    %c0_i32_0 = arith.constant 0 : i32
    %2 = arith.cmpi ne, %1, %c0_i32_0 : i32
    scf.if %2 {
      %cst_15 = arith.constant 0.000000e+00 : f32
      %c0_16 = arith.constant 0 : index
      %c0_17 = arith.constant 0 : index
      %28 = memref.load %arg4[%c0_16, %c0_17] : memref<1x1xf32, #tpu.memory_space<smem>>
      memref.store %cst_15, %arg4[%c0_16, %c0_17] : memref<1x1xf32, #tpu.memory_space<smem>>
    } else {
    }
    %c0 = arith.constant 0 : index
    %c0_1 = arith.constant 0 : index
    %3 = vector.load %arg1[%c0, %c0_1] : memref<8x128xf32, #tpu.memory_space<vmem>>, vector<8x128xf32>
    %c0_2 = arith.constant 0 : index
    %c0_3 = arith.constant 0 : index
    %4 = vector.load %arg2[%c0_2, %c0_3] : memref<8x128xf32, #tpu.memory_space<vmem>>, vector<8x128xf32>
    %cst = arith.constant 1.000000e+00 : f32
    %5 = vector.broadcast %cst : f32 to vector<8x128xf32>
    %6 = arith.subf %5, %3 : vector<8x128xf32>
    %cst_4 = arith.constant 0.000000e+00 : f32
    %7 = vector.broadcast %cst_4 : f32 to vector<8x128xf32>
    %8 = arith.maximumf %6, %7 : vector<8x128xf32>
    %9 = vector.shape_cast %8 : vector<8x128xf32> to vector<1x8x128xf32>
    %cst_5 = arith.constant dense<0.000000e+00> : vector<1xf32>
    %10 = vector.multi_reduction <add>, %9, %cst_5 [1, 2] : vector<1x8x128xf32> to vector<1xf32>
    %11 = vector.shape_cast %10 : vector<1xf32> to vector<1x1x1xf32>
    %12 = vector.extract %11[0, 0, 0] : f32 from vector<1x1x1xf32>
    %cst_6 = arith.constant 1.000000e+00 : f32
    %13 = vector.broadcast %cst_6 : f32 to vector<8x128xf32>
    %14 = arith.addf %13, %4 : vector<8x128xf32>
    %cst_7 = arith.constant 0.000000e+00 : f32
    %15 = vector.broadcast %cst_7 : f32 to vector<8x128xf32>
    %16 = arith.maximumf %14, %15 : vector<8x128xf32>
    %17 = vector.shape_cast %16 : vector<8x128xf32> to vector<1x8x128xf32>
    %cst_8 = arith.constant dense<0.000000e+00> : vector<1xf32>
    %18 = vector.multi_reduction <add>, %17, %cst_8 [1, 2] : vector<1x8x128xf32> to vector<1xf32>
    %19 = vector.shape_cast %18 : vector<1xf32> to vector<1x1x1xf32>
    %20 = vector.extract %19[0, 0, 0] : f32 from vector<1x1x1xf32>
    %21 = arith.addf %12, %20 : f32
    %c0_9 = arith.constant 0 : index
    %c0_10 = arith.constant 0 : index
    %22 = memref.load %arg4[%c0_9, %c0_10] : memref<1x1xf32, #tpu.memory_space<smem>>
    %23 = arith.addf %22, %21 : f32
    %c0_11 = arith.constant 0 : index
    %c0_12 = arith.constant 0 : index
    %24 = memref.load %arg4[%c0_11, %c0_12] : memref<1x1xf32, #tpu.memory_space<smem>>
    memref.store %23, %arg4[%c0_11, %c0_12] : memref<1x1xf32, #tpu.memory_space<smem>>
    %c0_i32_13 = arith.constant 0 : i32
    %25 = arith.cmpi eq, %arg0, %c0_i32_13 : i32
    %26 = arith.extui %25 : i1 to i32
    %c0_i32_14 = arith.constant 0 : i32
    %27 = arith.cmpi ne, %26, %c0_i32_14 : i32
    scf.if %27 {
      %c0_15 = arith.constant 0 : index
      %c0_16 = arith.constant 0 : index
      %28 = memref.load %arg4[%c0_15, %c0_16] : memref<1x1xf32, #tpu.memory_space<smem>>
      %c0_17 = arith.constant 0 : index
      %c0_18 = arith.constant 0 : index
      %29 = memref.load %arg3[%c0_17, %c0_18] : memref<1x1xf32, #tpu.memory_space<smem>>
      memref.store %28, %arg3[%c0_17, %c0_18] : memref<1x1xf32, #tpu.memory_space<smem>>
    } else {
    }
    return
  }
  func.func @transform_0(%arg0: i32) -> (i32, i32) {
    %c0_i32 = arith.constant 0 : i32
    %c0_i32_0 = arith.constant 0 : i32
    return %arg0, %c0_i32 : i32, i32
  }
  func.func @transform_1(%arg0: i32) -> (i32, i32) {
    %c0_i32 = arith.constant 0 : i32
    %c0_i32_0 = arith.constant 0 : i32
    return %arg0, %c0_i32 : i32, i32
  }
  func.func @transform_2(%arg0: i32) -> (i32, i32) {
    %c0_i32 = arith.constant 0 : i32
    %c0_i32_0 = arith.constant 0 : i32
    %c0_i32_1 = arith.constant 0 : i32
    return %c0_i32, %c0_i32_0 : i32, i32
  }
}

</mosaic_0001>

<bundles_post_ra>
// kernel: sn_patch_dis_loss.1
= control target key start
LH: loop header
LB: loop body
LE: loop exit
PB: predicated region body
PF: predicated region fallthrough
CT: control target
= control target key end

     0   :  { %s117_s0 = inlined_call_operand.vmem [shape: f32[8,128], index: 0, kind: input, shape index: {}]   ;;  %s118_s1 = inlined_call_operand.vmem [shape: f32[8,128], index: 1, kind: input, shape index: {}]   ;;  %s119_s2 = inlined_call_operand.hbm [shape: f32[1,1], index: 2, kind: output, shape index: {}]  }
   0x1   :  { %v18_v0 = vld [vmem:[%s117_s0] sm:$0xff] }
   0x2   :  { %v19_v1 = vld [vmem:[%s118_s1] sm:$0xff] }
   0x3   :  { %7 = vsyncpa [#allocation4], 0  ;;  %v20_v2 = vsub.f32 1.0, %v18_v0  ;;  %v31_v3 = vadd.f32 1.0, %v19_v1  ;;  %s71_s16 = scalar_lea.hbm %s119_s2, 16 }
   0x4   :  { %p72_p0 = scmp.ne.s32.totalorder %s119_s2, %s71_s16  ;;  %p75_p1 = scmp.lt.u32.totalorder %s71_s16, %s119_s2 }
   0x5   :  { %v21_v4 = vmax.f32 %v20_v2, 0.0  ;;  %v32_v5 = vmax.f32 %v31_v3, 0.0 }
   0x6   :  { %p77_p2 = pnand %p75_p1, %p72_p0 }
   0x7   :  { %22 = vadd.xlane.f32.xlu0 %v21_v4 }
   0xb   :  { %33 = vadd.xlane.f32.xlu0 %v32_v5 }
  0x94   :  { %v23_v6 = vpop.xlane.xlu0 %22 }
  0x95   :  { %v24_v7 = vrot.slane %v23_v6, 4 }
  0x97   :  { %v25_v8 = vadd.f32 %v24_v7, %v23_v6 }
  0x98   :  { %v34_v9 = vpop.xlane.xlu0 %33 }
  0x99   :  { %v26_v10 = vrot.slane %v25_v8, 2  ;;  %v35_v11 = vrot.slane %v34_v9, 4 }
  0x9b   :  { %v36_v12 = vadd.f32 %v35_v11, %v34_v9  ;;  %v27_v13 = vadd.f32 %v26_v10, %v25_v8 }
  0x9d   :  { %v37_v14 = vrot.slane %v36_v12, 2  ;;  %v28_v15 = vrot.slane %v27_v13, 1 }
  0x9f   :  { %v38_v16 = vadd.f32 %v37_v14, %v36_v12  ;;  %v29_v17 = vadd.f32 %v28_v15, %v27_v13 }
  0xa1   :  { %66 = vpush %v29_v17  ;;  %v39_v18 = vrot.slane %v38_v16, 1 }
  0xa3   :  { %v40_v19 = vadd.f32 %v39_v18, %v38_v16 }
  0xa5   :  { %68 = vpush %v40_v19 }
  0xd2   :  { %s67_s0 = spop %66 }
  0xd6   :  { %s69_s1 = spop %68 }
  0xd7   :  { %s42_s13 = sadd.f32 %s69_s1, %s67_s0 }
  0xd9   :  { %52 = sst [smem:[#allocation3]] %s42_s13 }
  0xda   :  { %80 = shalt.err (!%p77_p2)
}
  0xdb   :  { %s83_s21 = smov [#allocation3]  }
  0xdc   :  { %60 = dma.smem_to_hbm %s83_s21, 16, %s119_s2, [#allocation4]  }
  0xdd   :  { %81 = dma.done.wait [#allocation4], 16  }
  0xde   :  { %82 = vsyncadd [#allocation4], 4294967280 }
  0xdf   :  { %64 = sfence }
  0xe0   :  { %65 = vsyncpa [#allocation4], 1 }

</bundles_post_ra>
